<compile_context>
chip_gen: v7x
topology: tpu7x:2x2x1
jax: 0.10.0
libtpu: 0.0.40
codegen_flags: <defaults>
</compile_context>

<pallas_src>
import jax
import jax.numpy as jnp
from jax.experimental import pallas as pl
from jax.experimental.pallas import tpu as pltpu

EPS = 1e-5


def res_linear_kernel(x_ref, w1_ref, b1_ref, g1_ref, be1_ref,
                      w2_ref, b2_ref, g2_ref, be2_ref, o_ref):
    # x_ref: (B, tt, H) f32   w*_ref: (H, H) bf16, pre-transposed to (in, out)
    # b*_ref: (1, H) f32      g*/be*_ref: (tt, 1) f32 per-time-channel affine
    B, tt, H = x_ref.shape
    m = B * tt
    inv_n = 1.0 / float(B * H)   # BN reduces over (batch, hidden) per time step

    def bn_relu(y, g_ref, be_ref):
        # One-pass batch-norm statistics (sum, sum-of-squares), all in f32,
        # folded into a single fused scale/shift + ReLU pass.
        s = jnp.sum(y, axis=(0, 2), keepdims=True)            # (1, tt, 1)
        ss = jnp.sum(y * y, axis=(0, 2), keepdims=True)       # (1, tt, 1)
        mean = s * inv_n
        var = ss * inv_n - mean * mean
        scale = g_ref[...][None, :, :] * jax.lax.rsqrt(var + EPS)
        shift = be_ref[...][None, :, :] - mean * scale
        return jnp.maximum(y * scale + shift, 0.0)

    # ---- Linear 1: collapse (B, tt) -> M rows, bf16 MXU inputs, f32 acc ----
    x2 = x_ref[...].reshape(m, H).astype(jnp.bfloat16)
    y = jnp.dot(x2, w1_ref[...], preferred_element_type=jnp.float32)
    y = y.reshape(B, tt, H) + b1_ref[...]
    y = bn_relu(y, g1_ref, be1_ref)

    # ---- Linear 2 ----
    h2 = y.reshape(m, H).astype(jnp.bfloat16)
    y = jnp.dot(h2, w2_ref[...], preferred_element_type=jnp.float32)
    y = y.reshape(B, tt, H) + b2_ref[...]
    y = bn_relu(y, g2_ref, be2_ref)

    o_ref[...] = y.astype(o_ref.dtype)


def _choose_tt(B, T, target_rows=512):
    """Time-tile: divides T, multiple of 8 (or == T), B*tt <= target_rows,
    preferring >= 2 grid steps so the parallel axis can split across 2 TCs."""
    valid = [d for d in range(1, T + 1) if T % d == 0 and (d % 8 == 0 or d == T)]
    fits = [d for d in valid if B * d <= target_rows]
    if not fits:
        return min(valid)
    multi = [d for d in fits if T // d >= 2]
    return max(multi) if multi else max(fits)


def _vmem_limit_bytes(B, tt, H, single_buffer_weights):
    wbuf = 1 if single_buffer_weights else 2
    weights = 2 * wbuf * H * H * 2                 # two bf16 (H,H) weight tiles
    biases = 2 * 2 * (H * 4 + 2 * tt * 4)          # biases + gamma/beta
    blocks = 2 * B * tt * H * (4 + 4)              # double-buffered f32 x + out blocks
    temps = 8 * B * tt * H * 4                     # in-kernel f32 intermediates (headroom)
    est = int(1.25 * (weights + biases + blocks + temps)) + (1 << 20)
    return max(32 << 20, min(est, 64 << 20))       # stay within v7x's 64 MiB VMEM


def res_linear_layer(x, params, *, tt=None, target_rows=512,
                     single_buffer_weights=True):
    """x: (B, T, H) float32. params: (w1, b1, g1, be1, w2, b2, g2, be2)."""
    B, T, H = x.shape
    w1, b1, g1, be1, w2, b2, g2, be2 = params
    if tt is None:
        tt = _choose_tt(B, T, target_rows)
    assert T % tt == 0

    # Weights pre-transposed to (in, out) and cast to bf16 for the MXU;
    # BN parameters stay f32 (BN math is done in f32 inside the kernel).
    w1t = w1.T.astype(jnp.bfloat16)
    w2t = w2.T.astype(jnp.bfloat16)
    b1r = b1.reshape(1, H).astype(jnp.float32)
    b2r = b2.reshape(1, H).astype(jnp.float32)
    g1r = g1.reshape(T, 1).astype(jnp.float32)
    be1r = be1.reshape(T, 1).astype(jnp.float32)
    g2r = g2.reshape(T, 1).astype(jnp.float32)
    be2r = be2.reshape(T, 1).astype(jnp.float32)
    args = (x.astype(jnp.float32), w1t, b1r, g1r, be1r, w2t, b2r, g2r, be2r)

    full = lambda t: (0, 0)
    per_t = lambda t: (t, 0)

    def build(single_buf):
        # Weights/biases have a constant block index across the grid: single-
        # buffer them so VMEM is not spent on buffers that are never re-fetched.
        const_kw = dict(pipeline_mode=pl.Buffered(1)) if single_buf else {}
        in_specs = [
            pl.BlockSpec((B, tt, H), lambda t: (0, t, 0)),        # x
            pl.BlockSpec((H, H), full, **const_kw),               # w1 (in,out) bf16
            pl.BlockSpec((1, H), full, **const_kw),               # b1
            pl.BlockSpec((tt, 1), per_t),                         # gamma1
            pl.BlockSpec((tt, 1), per_t),                         # beta1
            pl.BlockSpec((H, H), full, **const_kw),               # w2 (in,out) bf16
            pl.BlockSpec((1, H), full, **const_kw),               # b2
            pl.BlockSpec((tt, 1), per_t),                         # gamma2
            pl.BlockSpec((tt, 1), per_t),                         # beta2
        ]
        return pl.pallas_call(
            res_linear_kernel,
            out_shape=jax.ShapeDtypeStruct((B, T, H), jnp.float32),
            grid=(T // tt,),
            in_specs=in_specs,
            out_specs=pl.BlockSpec((B, tt, H), lambda t: (0, t, 0)),
            compiler_params=pltpu.CompilerParams(
                dimension_semantics=("parallel",),
                vmem_limit_bytes=_vmem_limit_bytes(B, tt, H, single_buf)),
        )

    if single_buffer_weights:
        try:
            return jax.block_until_ready(build(True)(*args))
        except Exception:
            # pl.Buffered(1) not supported by this JAX/Mosaic build: fall back
            # to default double-buffered weights (identical results, more VMEM).
            pass
    return build(False)(*args)


def ref_forward(x, params):
    """Pure-JAX f32 reference mirroring PyTorch training-mode forward."""
    w1, b1, g1, be1, w2, b2, g2, be2 = params

    def bn_relu(y, g, be):
        mean = y.mean(axis=(0, 2), keepdims=True)
        var = ((y - mean) ** 2).mean(axis=(0, 2), keepdims=True)
        y = (y - mean) / jnp.sqrt(var + EPS)
        y = y * g[None, :, None] + be[None, :, None]
        return jnp.maximum(y, 0.0)

    y = x @ w1.T + b1
    y = bn_relu(y, g1, be1)
    y = y @ w2.T + b2
    return bn_relu(y, g2, be2)


def init_params(key, hidden, time):
    """Deterministic init matching nn.Linear / nn.BatchNorm1d defaults."""
    k1, k2, k3, k4 = jax.random.split(key, 4)
    bound = 1.0 / jnp.sqrt(hidden)
    w1 = jax.random.uniform(k1, (hidden, hidden), jnp.float32, -bound, bound)
    b1 = jax.random.uniform(k2, (hidden,), jnp.float32, -bound, bound)
    w2 = jax.random.uniform(k3, (hidden, hidden), jnp.float32, -bound, bound)
    b2 = jax.random.uniform(k4, (hidden,), jnp.float32, -bound, bound)
    g1 = jnp.ones((time,), jnp.float32)
    be1 = jnp.zeros((time,), jnp.float32)
    g2 = jnp.ones((time,), jnp.float32)
    be2 = jnp.zeros((time,), jnp.float32)
    return (w1, b1, g1, be1, w2, b2, g2, be2)


if __name__ == "__main__":
    B, T, H = 2, 16, 32   # small stand-ins for (batch, time=1024, linear_hidden=1024)
    key = jax.random.PRNGKey(0)
    kx, kp = jax.random.split(key)
    x = jax.random.normal(kx, (B, T, H), jnp.float32)
    params = init_params(kp, H, T)

    out = res_linear_layer(x, params)
    out = jax.block_until_ready(out)

    ref = ref_forward(x, params)
    assert out.shape == (B, T, H)
    err = float(jnp.max(jnp.abs(out - ref)))
    # bf16 MXU inputs (f32 accumulation, f32 BN math) -> small drift vs f32 ref.
    assert err < 3e-2, err
    print("KERNEL_OK")
</pallas_src>

<mosaic_0001>
module attributes {stable_mosaic.version = 11 : i64} {
  func.func @res_linear_kernel(%arg0: i32, %arg1: memref<2x8x32xf32, #tpu.memory_space<vmem>>, %arg2: memref<32x32xbf16, #tpu.memory_space<vmem>>, %arg3: memref<1x32xf32, #tpu.memory_space<vmem>>, %arg4: memref<8x1xf32, #tpu.memory_space<vmem>>, %arg5: memref<8x1xf32, #tpu.memory_space<vmem>>, %arg6: memref<32x32xbf16, #tpu.memory_space<vmem>>, %arg7: memref<1x32xf32, #tpu.memory_space<vmem>>, %arg8: memref<8x1xf32, #tpu.memory_space<vmem>>, %arg9: memref<8x1xf32, #tpu.memory_space<vmem>>, %arg10: memref<2x8x32xf32, #tpu.memory_space<vmem>>) attributes {dimension_semantics = [#tpu.dimension_semantics<parallel>], iteration_bounds = array<i64: 2>, scalar_prefetch = 0 : i64, scratch_operands = 0 : i64, tpu.core_type = #tpu.core_type<tc>, window_params = [{transform_indices = @transform_0, window_bounds = array<i64: 2, 8, 32>}, {pipeline_mode = #tpu.pipeline_mode<synchronous>, transform_indices = @transform_1, window_bounds = array<i64: 32, 32>}, {pipeline_mode = #tpu.pipeline_mode<synchronous>, transform_indices = @transform_2, window_bounds = array<i64: 1, 32>}, {transform_indices = @transform_3, window_bounds = array<i64: 8, 1>}, {transform_indices = @transform_4, window_bounds = array<i64: 8, 1>}, {pipeline_mode = #tpu.pipeline_mode<synchronous>, transform_indices = @transform_5, window_bounds = array<i64: 32, 32>}, {pipeline_mode = #tpu.pipeline_mode<synchronous>, transform_indices = @transform_6, window_bounds = array<i64: 1, 32>}, {transform_indices = @transform_7, window_bounds = array<i64: 8, 1>}, {transform_indices = @transform_8, window_bounds = array<i64: 8, 1>}, {transform_indices = @transform_9, window_bounds = array<i64: 2, 8, 32>}]} {
    %c0 = arith.constant 0 : index
    %c0_0 = arith.constant 0 : index
    %c0_1 = arith.constant 0 : index
    %0 = vector.load %arg1[%c0, %c0_0, %c0_1] : memref<2x8x32xf32, #tpu.memory_space<vmem>>, vector<2x8x32xf32>
    %1 = vector.shape_cast %0 : vector<2x8x32xf32> to vector<16x32xf32>
    %2 = arith.truncf %1 : vector<16x32xf32> to vector<16x32xbf16>
    %c0_2 = arith.constant 0 : index
    %c0_3 = arith.constant 0 : index
    %3 = vector.load %arg2[%c0_2, %c0_3] : memref<32x32xbf16, #tpu.memory_space<vmem>>, vector<32x32xbf16>
    %cst = arith.constant dense<0.000000e+00> : vector<16x32xf32>
    %4 = tpu.matmul %2, %3, %cst {dimension_numbers = #tpu.dot_dimension_numbers<[1], [0], [0], [1], [0, 0, 1, 1], [], []>} : vector<16x32xbf16>, vector<32x32xbf16>, vector<16x32xf32> -> vector<16x32xf32>
    %5 = vector.shape_cast %4 : vector<16x32xf32> to vector<2x8x32xf32>
    %c0_4 = arith.constant 0 : index
    %c0_5 = arith.constant 0 : index
    %6 = vector.load %arg3[%c0_4, %c0_5] : memref<1x32xf32, #tpu.memory_space<vmem>>, vector<1x32xf32>
    %7 = vector.shape_cast %6 : vector<1x32xf32> to vector<1x1x32xf32>
    %8 = vector.broadcast %7 : vector<1x1x32xf32> to vector<2x8x32xf32>
    %9 = arith.addf %5, %8 : vector<2x8x32xf32>
    %cst_6 = arith.constant dense<0.000000e+00> : vector<8xf32>
    %10 = vector.multi_reduction <add>, %9, %cst_6 [0, 2] : vector<2x8x32xf32> to vector<8xf32>
    %11 = vector.shape_cast %10 : vector<8xf32> to vector<1x8x1xf32>
    %12 = arith.mulf %9, %9 : vector<2x8x32xf32>
    %cst_7 = arith.constant dense<0.000000e+00> : vector<8xf32>
    %13 = vector.multi_reduction <add>, %12, %cst_7 [0, 2] : vector<2x8x32xf32> to vector<8xf32>
    %14 = vector.shape_cast %13 : vector<8xf32> to vector<1x8x1xf32>
    %cst_8 = arith.constant 1.562500e-02 : f32
    %15 = vector.broadcast %cst_8 : f32 to vector<1x8x1xf32>
    %16 = arith.mulf %11, %15 : vector<1x8x1xf32>
    %cst_9 = arith.constant 1.562500e-02 : f32
    %17 = vector.broadcast %cst_9 : f32 to vector<1x8x1xf32>
    %18 = arith.mulf %14, %17 : vector<1x8x1xf32>
    %19 = arith.mulf %16, %16 : vector<1x8x1xf32>
    %20 = arith.subf %18, %19 : vector<1x8x1xf32>
    %c0_10 = arith.constant 0 : index
    %c0_11 = arith.constant 0 : index
    %21 = vector.load %arg4[%c0_10, %c0_11] : memref<8x1xf32, #tpu.memory_space<vmem>>, vector<8x1xf32>
    %22 = vector.shape_cast %21 : vector<8x1xf32> to vector<1x8x1xf32>
    %cst_12 = arith.constant 9.99999974E-6 : f32
    %23 = vector.broadcast %cst_12 : f32 to vector<1x8x1xf32>
    %24 = arith.addf %20, %23 : vector<1x8x1xf32>
    %25 = math.rsqrt %24 : vector<1x8x1xf32>
    %26 = arith.mulf %22, %25 : vector<1x8x1xf32>
    %c0_13 = arith.constant 0 : index
    %c0_14 = arith.constant 0 : index
    %27 = vector.load %arg5[%c0_13, %c0_14] : memref<8x1xf32, #tpu.memory_space<vmem>>, vector<8x1xf32>
    %28 = vector.shape_cast %27 : vector<8x1xf32> to vector<1x8x1xf32>
    %29 = arith.mulf %16, %26 : vector<1x8x1xf32>
    %30 = arith.subf %28, %29 : vector<1x8x1xf32>
    %31 = vector.broadcast %26 : vector<1x8x1xf32> to vector<2x8x32xf32>
    %32 = arith.mulf %9, %31 : vector<2x8x32xf32>
    %33 = vector.broadcast %30 : vector<1x8x1xf32> to vector<2x8x32xf32>
    %34 = arith.addf %32, %33 : vector<2x8x32xf32>
    %cst_15 = arith.constant 0.000000e+00 : f32
    %35 = vector.broadcast %cst_15 : f32 to vector<2x8x32xf32>
    %36 = arith.maximumf %34, %35 : vector<2x8x32xf32>
    %37 = vector.shape_cast %36 : vector<2x8x32xf32> to vector<16x32xf32>
    %38 = arith.truncf %37 : vector<16x32xf32> to vector<16x32xbf16>
    %c0_16 = arith.constant 0 : index
    %c0_17 = arith.constant 0 : index
    %39 = vector.load %arg6[%c0_16, %c0_17] : memref<32x32xbf16, #tpu.memory_space<vmem>>, vector<32x32xbf16>
    %cst_18 = arith.constant dense<0.000000e+00> : vector<16x32xf32>
    %40 = tpu.matmul %38, %39, %cst_18 {dimension_numbers = #tpu.dot_dimension_numbers<[1], [0], [0], [1], [0, 0, 1, 1], [], []>} : vector<16x32xbf16>, vector<32x32xbf16>, vector<16x32xf32> -> vector<16x32xf32>
    %41 = vector.shape_cast %40 : vector<16x32xf32> to vector<2x8x32xf32>
    %c0_19 = arith.constant 0 : index
    %c0_20 = arith.constant 0 : index
    %42 = vector.load %arg7[%c0_19, %c0_20] : memref<1x32xf32, #tpu.memory_space<vmem>>, vector<1x32xf32>
    %43 = vector.shape_cast %42 : vector<1x32xf32> to vector<1x1x32xf32>
    %44 = vector.broadcast %43 : vector<1x1x32xf32> to vector<2x8x32xf32>
    %45 = arith.addf %41, %44 : vector<2x8x32xf32>
    %cst_21 = arith.constant dense<0.000000e+00> : vector<8xf32>
    %46 = vector.multi_reduction <add>, %45, %cst_21 [0, 2] : vector<2x8x32xf32> to vector<8xf32>
    %47 = vector.shape_cast %46 : vector<8xf32> to vector<1x8x1xf32>
    %48 = arith.mulf %45, %45 : vector<2x8x32xf32>
    %cst_22 = arith.constant dense<0.000000e+00> : vector<8xf32>
    %49 = vector.multi_reduction <add>, %48, %cst_22 [0, 2] : vector<2x8x32xf32> to vector<8xf32>
    %50 = vector.shape_cast %49 : vector<8xf32> to vector<1x8x1xf32>
    %cst_23 = arith.constant 1.562500e-02 : f32
    %51 = vector.broadcast %cst_23 : f32 to vector<1x8x1xf32>
    %52 = arith.mulf %47, %51 : vector<1x8x1xf32>
    %cst_24 = arith.constant 1.562500e-02 : f32
    %53 = vector.broadcast %cst_24 : f32 to vector<1x8x1xf32>
    %54 = arith.mulf %50, %53 : vector<1x8x1xf32>
    %55 = arith.mulf %52, %52 : vector<1x8x1xf32>
    %56 = arith.subf %54, %55 : vector<1x8x1xf32>
    %c0_25 = arith.constant 0 : index
    %c0_26 = arith.constant 0 : index
    %57 = vector.load %arg8[%c0_25, %c0_26] : memref<8x1xf32, #tpu.memory_space<vmem>>, vector<8x1xf32>
    %58 = vector.shape_cast %57 : vector<8x1xf32> to vector<1x8x1xf32>
    %cst_27 = arith.constant 9.99999974E-6 : f32
    %59 = vector.broadcast %cst_27 : f32 to vector<1x8x1xf32>
    %60 = arith.addf %56, %59 : vector<1x8x1xf32>
    %61 = math.rsqrt %60 : vector<1x8x1xf32>
    %62 = arith.mulf %58, %61 : vector<1x8x1xf32>
    %c0_28 = arith.constant 0 : index
    %c0_29 = arith.constant 0 : index
    %63 = vector.load %arg9[%c0_28, %c0_29] : memref<8x1xf32, #tpu.memory_space<vmem>>, vector<8x1xf32>
    %64 = vector.shape_cast %63 : vector<8x1xf32> to vector<1x8x1xf32>
    %65 = arith.mulf %52, %62 : vector<1x8x1xf32>
    %66 = arith.subf %64, %65 : vector<1x8x1xf32>
    %67 = vector.broadcast %62 : vector<1x8x1xf32> to vector<2x8x32xf32>
    %68 = arith.mulf %45, %67 : vector<2x8x32xf32>
    %69 = vector.broadcast %66 : vector<1x8x1xf32> to vector<2x8x32xf32>
    %70 = arith.addf %68, %69 : vector<2x8x32xf32>
    %cst_30 = arith.constant 0.000000e+00 : f32
    %71 = vector.broadcast %cst_30 : f32 to vector<2x8x32xf32>
    %72 = arith.maximumf %70, %71 : vector<2x8x32xf32>
    %c0_31 = arith.constant 0 : index
    %c0_32 = arith.constant 0 : index
    %c0_33 = arith.constant 0 : index
    %73 = vector.load %arg10[%c0_31, %c0_32, %c0_33] : memref<2x8x32xf32, #tpu.memory_space<vmem>>, vector<2x8x32xf32>
    tpu.vector_store %arg10[%c0_31, %c0_32, %c0_33], %72 {strides = array<i32>} : memref<2x8x32xf32, #tpu.memory_space<vmem>>, vector<2x8x32xf32>,
    return
  }
  func.func @transform_0(%arg0: i32) -> (i32, i32, i32) {
    %c0_i32 = arith.constant 0 : i32
    %c0_i32_0 = arith.constant 0 : i32
    %c0_i32_1 = arith.constant 0 : i32
    return %c0_i32, %arg0, %c0_i32_0 : i32, i32, i32
  }
  func.func @transform_1(%arg0: i32) -> (i32, i32) {
    %c0_i32 = arith.constant 0 : i32
    %c0_i32_0 = arith.constant 0 : i32
    %c0_i32_1 = arith.constant 0 : i32
    return %c0_i32, %c0_i32_0 : i32, i32
  }
  func.func @transform_2(%arg0: i32) -> (i32, i32) {
    %c0_i32 = arith.constant 0 : i32
    %c0_i32_0 = arith.constant 0 : i32
    %c0_i32_1 = arith.constant 0 : i32
    return %c0_i32, %c0_i32_0 : i32, i32
  }
  func.func @transform_3(%arg0: i32) -> (i32, i32) {
    %c0_i32 = arith.constant 0 : i32
    %c0_i32_0 = arith.constant 0 : i32
    return %arg0, %c0_i32 : i32, i32
  }
  func.func @transform_4(%arg0: i32) -> (i32, i32) {
    %c0_i32 = arith.constant 0 : i32
    %c0_i32_0 = arith.constant 0 : i32
    return %arg0, %c0_i32 : i32, i32
  }
  func.func @transform_5(%arg0: i32) -> (i32, i32) {
    %c0_i32 = arith.constant 0 : i32
    %c0_i32_0 = arith.constant 0 : i32
    %c0_i32_1 = arith.constant 0 : i32
    return %c0_i32, %c0_i32_0 : i32, i32
  }
  func.func @transform_6(%arg0: i32) -> (i32, i32) {
    %c0_i32 = arith.constant 0 : i32
    %c0_i32_0 = arith.constant 0 : i32
    %c0_i32_1 = arith.constant 0 : i32
    return %c0_i32, %c0_i32_0 : i32, i32
  }
  func.func @transform_7(%arg0: i32) -> (i32, i32) {
    %c0_i32 = arith.constant 0 : i32
    %c0_i32_0 = arith.constant 0 : i32
    return %arg0, %c0_i32 : i32, i32
  }
  func.func @transform_8(%arg0: i32) -> (i32, i32) {
    %c0_i32 = arith.constant 0 : i32
    %c0_i32_0 = arith.constant 0 : i32
    return %arg0, %c0_i32 : i32, i32
  }
  func.func @transform_9(%arg0: i32) -> (i32, i32, i32) {
    %c0_i32 = arith.constant 0 : i32
    %c0_i32_0 = arith.constant 0 : i32
    %c0_i32_1 = arith.constant 0 : i32
    return %c0_i32, %arg0, %c0_i32_0 : i32, i32, i32
  }
}

module attributes {stable_mosaic.version = 11 : i64} {
  func.func @res_linear_kernel(%arg0: i32, %arg1: memref<2x8x32xf32, #tpu.memory_space<vmem>>, %arg2: memref<32x32xbf16, #tpu.memory_space<vmem>>, %arg3: memref<1x32xf32, #tpu.memory_space<vmem>>, %arg4: memref<8x1xf32, #tpu.memory_space<vmem>>, %arg5: memref<8x1xf32, #tpu.memory_space<vmem>>, %arg6: memref<32x32xbf16, #tpu.memory_space<vmem>>, %arg7: memref<1x32xf32, #tpu.memory_space<vmem>>, %arg8: memref<8x1xf32, #tpu.memory_space<vmem>>, %arg9: memref<8x1xf32, #tpu.memory_space<vmem>>, %arg10: memref<2x8x32xf32, #tpu.memory_space<vmem>>) attributes {dimension_semantics = [#tpu.dimension_semantics<parallel>], iteration_bounds = array<i64: 2>, scalar_prefetch = 0 : i64, scratch_operands = 0 : i64, tpu.core_type = #tpu.core_type<tc>, window_params = [{transform_indices = @transform_0, window_bounds = array<i64: 2, 8, 32>}, {pipeline_mode = #tpu.pipeline_mode<synchronous>, transform_indices = @transform_1, window_bounds = array<i64: 32, 32>}, {pipeline_mode = #tpu.pipeline_mode<synchronous>, transform_indices = @transform_2, window_bounds = array<i64: 1, 32>}, {transform_indices = @transform_3, window_bounds = array<i64: 8, 1>}, {transform_indices = @transform_4, window_bounds = array<i64: 8, 1>}, {pipeline_mode = #tpu.pipeline_mode<synchronous>, transform_indices = @transform_5, window_bounds = array<i64: 32, 32>}, {pipeline_mode = #tpu.pipeline_mode<synchronous>, transform_indices = @transform_6, window_bounds = array<i64: 1, 32>}, {transform_indices = @transform_7, window_bounds = array<i64: 8, 1>}, {transform_indices = @transform_8, window_bounds = array<i64: 8, 1>}, {transform_indices = @transform_9, window_bounds = array<i64: 2, 8, 32>}]} {
    %c0 = arith.constant 0 : index
    %c0_0 = arith.constant 0 : index
    %c0_1 = arith.constant 0 : index
    %0 = vector.load %arg1[%c0, %c0_0, %c0_1] : memref<2x8x32xf32, #tpu.memory_space<vmem>>, vector<2x8x32xf32>
    %1 = vector.shape_cast %0 : vector<2x8x32xf32> to vector<16x32xf32>
    %2 = arith.truncf %1 : vector<16x32xf32> to vector<16x32xbf16>
    %c0_2 = arith.constant 0 : index
    %c0_3 = arith.constant 0 : index
    %3 = vector.load %arg2[%c0_2, %c0_3] : memref<32x32xbf16, #tpu.memory_space<vmem>>, vector<32x32xbf16>
    %cst = arith.constant dense<0.000000e+00> : vector<16x32xf32>
    %4 = tpu.matmul %2, %3, %cst {dimension_numbers = #tpu.dot_dimension_numbers<[1], [0], [0], [1], [0, 0, 1, 1], [], []>} : vector<16x32xbf16>, vector<32x32xbf16>, vector<16x32xf32> -> vector<16x32xf32>
    %5 = vector.shape_cast %4 : vector<16x32xf32> to vector<2x8x32xf32>
    %c0_4 = arith.constant 0 : index
    %c0_5 = arith.constant 0 : index
    %6 = vector.load %arg3[%c0_4, %c0_5] : memref<1x32xf32, #tpu.memory_space<vmem>>, vector<1x32xf32>
    %7 = vector.shape_cast %6 : vector<1x32xf32> to vector<1x1x32xf32>
    %8 = vector.broadcast %7 : vector<1x1x32xf32> to vector<2x8x32xf32>
    %9 = arith.addf %5, %8 : vector<2x8x32xf32>
    %cst_6 = arith.constant dense<0.000000e+00> : vector<8xf32>
    %10 = vector.multi_reduction <add>, %9, %cst_6 [0, 2] : vector<2x8x32xf32> to vector<8xf32>
    %11 = vector.shape_cast %10 : vector<8xf32> to vector<1x8x1xf32>
    %12 = arith.mulf %9, %9 : vector<2x8x32xf32>
    %cst_7 = arith.constant dense<0.000000e+00> : vector<8xf32>
    %13 = vector.multi_reduction <add>, %12, %cst_7 [0, 2] : vector<2x8x32xf32> to vector<8xf32>
    %14 = vector.shape_cast %13 : vector<8xf32> to vector<1x8x1xf32>
    %cst_8 = arith.constant 1.562500e-02 : f32
    %15 = vector.broadcast %cst_8 : f32 to vector<1x8x1xf32>
    %16 = arith.mulf %11, %15 : vector<1x8x1xf32>
    %cst_9 = arith.constant 1.562500e-02 : f32
    %17 = vector.broadcast %cst_9 : f32 to vector<1x8x1xf32>
    %18 = arith.mulf %14, %17 : vector<1x8x1xf32>
    %19 = arith.mulf %16, %16 : vector<1x8x1xf32>
    %20 = arith.subf %18, %19 : vector<1x8x1xf32>
    %c0_10 = arith.constant 0 : index
    %c0_11 = arith.constant 0 : index
    %21 = vector.load %arg4[%c0_10, %c0_11] : memref<8x1xf32, #tpu.memory_space<vmem>>, vector<8x1xf32>
    %22 = vector.shape_cast %21 : vector<8x1xf32> to vector<1x8x1xf32>
    %cst_12 = arith.constant 9.99999974E-6 : f32
    %23 = vector.broadcast %cst_12 : f32 to vector<1x8x1xf32>
    %24 = arith.addf %20, %23 : vector<1x8x1xf32>
    %25 = math.rsqrt %24 : vector<1x8x1xf32>
    %26 = arith.mulf %22, %25 : vector<1x8x1xf32>
    %c0_13 = arith.constant 0 : index
    %c0_14 = arith.constant 0 : index
    %27 = vector.load %arg5[%c0_13, %c0_14] : memref<8x1xf32, #tpu.memory_space<vmem>>, vector<8x1xf32>
    %28 = vector.shape_cast %27 : vector<8x1xf32> to vector<1x8x1xf32>
    %29 = arith.mulf %16, %26 : vector<1x8x1xf32>
    %30 = arith.subf %28, %29 : vector<1x8x1xf32>
    %31 = vector.broadcast %26 : vector<1x8x1xf32> to vector<2x8x32xf32>
    %32 = arith.mulf %9, %31 : vector<2x8x32xf32>
    %33 = vector.broadcast %30 : vector<1x8x1xf32> to vector<2x8x32xf32>
    %34 = arith.addf %32, %33 : vector<2x8x32xf32>
    %cst_15 = arith.constant 0.000000e+00 : f32
    %35 = vector.broadcast %cst_15 : f32 to vector<2x8x32xf32>
    %36 = arith.maximumf %34, %35 : vector<2x8x32xf32>
    %37 = vector.shape_cast %36 : vector<2x8x32xf32> to vector<16x32xf32>
    %38 = arith.truncf %37 : vector<16x32xf32> to vector<16x32xbf16>
    %c0_16 = arith.constant 0 : index
    %c0_17 = arith.constant 0 : index
    %39 = vector.load %arg6[%c0_16, %c0_17] : memref<32x32xbf16, #tpu.memory_space<vmem>>, vector<32x32xbf16>
    %cst_18 = arith.constant dense<0.000000e+00> : vector<16x32xf32>
    %40 = tpu.matmul %38, %39, %cst_18 {dimension_numbers = #tpu.dot_dimension_numbers<[1], [0], [0], [1], [0, 0, 1, 1], [], []>} : vector<16x32xbf16>, vector<32x32xbf16>, vector<16x32xf32> -> vector<16x32xf32>
    %41 = vector.shape_cast %40 : vector<16x32xf32> to vector<2x8x32xf32>
    %c0_19 = arith.constant 0 : index
    %c0_20 = arith.constant 0 : index
    %42 = vector.load %arg7[%c0_19, %c0_20] : memref<1x32xf32, #tpu.memory_space<vmem>>, vector<1x32xf32>
    %43 = vector.shape_cast %42 : vector<1x32xf32> to vector<1x1x32xf32>
    %44 = vector.broadcast %43 : vector<1x1x32xf32> to vector<2x8x32xf32>
    %45 = arith.addf %41, %44 : vector<2x8x32xf32>
    %cst_21 = arith.constant dense<0.000000e+00> : vector<8xf32>
    %46 = vector.multi_reduction <add>, %45, %cst_21 [0, 2] : vector<2x8x32xf32> to vector<8xf32>
    %47 = vector.shape_cast %46 : vector<8xf32> to vector<1x8x1xf32>
    %48 = arith.mulf %45, %45 : vector<2x8x32xf32>
    %cst_22 = arith.constant dense<0.000000e+00> : vector<8xf32>
    %49 = vector.multi_reduction <add>, %48, %cst_22 [0, 2] : vector<2x8x32xf32> to vector<8xf32>
    %50 = vector.shape_cast %49 : vector<8xf32> to vector<1x8x1xf32>
    %cst_23 = arith.constant 1.562500e-02 : f32
    %51 = vector.broadcast %cst_23 : f32 to vector<1x8x1xf32>
    %52 = arith.mulf %47, %51 : vector<1x8x1xf32>
    %cst_24 = arith.constant 1.562500e-02 : f32
    %53 = vector.broadcast %cst_24 : f32 to vector<1x8x1xf32>
    %54 = arith.mulf %50, %53 : vector<1x8x1xf32>
    %55 = arith.mulf %52, %52 : vector<1x8x1xf32>
    %56 = arith.subf %54, %55 : vector<1x8x1xf32>
    %c0_25 = arith.constant 0 : index
    %c0_26 = arith.constant 0 : index
    %57 = vector.load %arg8[%c0_25, %c0_26] : memref<8x1xf32, #tpu.memory_space<vmem>>, vector<8x1xf32>
    %58 = vector.shape_cast %57 : vector<8x1xf32> to vector<1x8x1xf32>
    %cst_27 = arith.constant 9.99999974E-6 : f32
    %59 = vector.broadcast %cst_27 : f32 to vector<1x8x1xf32>
    %60 = arith.addf %56, %59 : vector<1x8x1xf32>
    %61 = math.rsqrt %60 : vector<1x8x1xf32>
    %62 = arith.mulf %58, %61 : vector<1x8x1xf32>
    %c0_28 = arith.constant 0 : index
    %c0_29 = arith.constant 0 : index
    %63 = vector.load %arg9[%c0_28, %c0_29] : memref<8x1xf32, #tpu.memory_space<vmem>>, vector<8x1xf32>
    %64 = vector.shape_cast %63 : vector<8x1xf32> to vector<1x8x1xf32>
    %65 = arith.mulf %52, %62 : vector<1x8x1xf32>
    %66 = arith.subf %64, %65 : vector<1x8x1xf32>
    %67 = vector.broadcast %62 : vector<1x8x1xf32> to vector<2x8x32xf32>
    %68 = arith.mulf %45, %67 : vector<2x8x32xf32>
    %69 = vector.broadcast %66 : vector<1x8x1xf32> to vector<2x8x32xf32>
    %70 = arith.addf %68, %69 : vector<2x8x32xf32>
    %cst_30 = arith.constant 0.000000e+00 : f32
    %71 = vector.broadcast %cst_30 : f32 to vector<2x8x32xf32>
    %72 = arith.maximumf %70, %71 : vector<2x8x32xf32>
    %c0_31 = arith.constant 0 : index
    %c0_32 = arith.constant 0 : index
    %c0_33 = arith.constant 0 : index
    %73 = vector.load %arg10[%c0_31, %c0_32, %c0_33] : memref<2x8x32xf32, #tpu.memory_space<vmem>>, vector<2x8x32xf32>
    tpu.vector_store %arg10[%c0_31, %c0_32, %c0_33], %72 {strides = array<i32>} : memref<2x8x32xf32, #tpu.memory_space<vmem>>, vector<2x8x32xf32>,
    return
  }
  func.func @transform_0(%arg0: i32) -> (i32, i32, i32) {
    %c0_i32 = arith.constant 0 : i32
    %c0_i32_0 = arith.constant 0 : i32
    %c0_i32_1 = arith.constant 0 : i32
    return %c0_i32, %arg0, %c0_i32_0 : i32, i32, i32
  }
  func.func @transform_1(%arg0: i32) -> (i32, i32) {
    %c0_i32 = arith.constant 0 : i32
    %c0_i32_0 = arith.constant 0 : i32
    %c0_i32_1 = arith.constant 0 : i32
    return %c0_i32, %c0_i32_0 : i32, i32
  }
  func.func @transform_2(%arg0: i32) -> (i32, i32) {
    %c0_i32 = arith.constant 0 : i32
    %c0_i32_0 = arith.constant 0 : i32
    %c0_i32_1 = arith.constant 0 : i32
    return %c0_i32, %c0_i32_0 : i32, i32
  }
  func.func @transform_3(%arg0: i32) -> (i32, i32) {
    %c0_i32 = arith.constant 0 : i32
    %c0_i32_0 = arith.constant 0 : i32
    return %arg0, %c0_i32 : i32, i32
  }
  func.func @transform_4(%arg0: i32) -> (i32, i32) {
    %c0_i32 = arith.constant 0 : i32
    %c0_i32_0 = arith.constant 0 : i32
    return %arg0, %c0_i32 : i32, i32
  }
  func.func @transform_5(%arg0: i32) -> (i32, i32) {
    %c0_i32 = arith.constant 0 : i32
    %c0_i32_0 = arith.constant 0 : i32
    %c0_i32_1 = arith.constant 0 : i32
    return %c0_i32, %c0_i32_0 : i32, i32
  }
  func.func @transform_6(%arg0: i32) -> (i32, i32) {
    %c0_i32 = arith.constant 0 : i32
    %c0_i32_0 = arith.constant 0 : i32
    %c0_i32_1 = arith.constant 0 : i32
    return %c0_i32, %c0_i32_0 : i32, i32
  }
  func.func @transform_7(%arg0: i32) -> (i32, i32) {
    %c0_i32 = arith.constant 0 : i32
    %c0_i32_0 = arith.constant 0 : i32
    return %arg0, %c0_i32 : i32, i32
  }
  func.func @transform_8(%arg0: i32) -> (i32, i32) {
    %c0_i32 = arith.constant 0 : i32
    %c0_i32_0 = arith.constant 0 : i32
    return %arg0, %c0_i32 : i32, i32
  }
  func.func @transform_9(%arg0: i32) -> (i32, i32, i32) {
    %c0_i32 = arith.constant 0 : i32
    %c0_i32_0 = arith.constant 0 : i32
    %c0_i32_1 = arith.constant 0 : i32
    return %c0_i32, %arg0, %c0_i32_0 : i32, i32, i32
  }
}

</mosaic_0001>

<bundles_post_ra>
// kernel: tpu_custom_call.1
= control target key start
LH: loop header
LB: loop body
LE: loop exit
PB: predicated region body
PF: predicated region fallthrough
CT: control target
= control target key end

     0   :  { %14 = vsyncpa [#allocation4], 0  ;;  %s1178_s0 = inlined_call_operand.vmem [shape: f32[2,16,32], index: 0, kind: input, shape index: {}]   ;;  %s1179_s1 = inlined_call_operand.vmem [shape: bf16[32,32], index: 1, kind: input, shape index: {}]   ;;  %s1180_s2 = inlined_call_operand.vmem [shape: f32[1,32], index: 2, kind: input, shape index: {}]   ;;  %s1181_s3 = inlined_call_operand.vmem [shape: f32[16,1], index: 3, kind: input, shape index: {}]   ;;  %s1182_s4 = inlined_call_operand.vmem [shape: f32[16,1], index: 4, kind: input, shape index: {}]   ;;  %s1183_s5 = inlined_call_operand.vmem [shape: bf16[32,32], index: 5, kind: input, shape index: {}]   ;;  %s1184_s6 = inlined_call_operand.vmem [shape: f32[1,32], index: 6, kind: input, shape index: {}]   ;;  %s1185_s7 = inlined_call_operand.vmem [shape: f32[16,1], index: 7, kind: input, shape index: {}]   ;;  %s1186_s8 = inlined_call_operand.vmem [shape: f32[16,1], index: 8, kind: input, shape index: {}]   ;;  %s1187_s9 = inlined_call_operand.hbm [shape: f32[2,16,32], index: 9, kind: output, shape index: {}]  }
   0x1   :  { %16 = vsyncpa [#allocation4 + $0x1], 0  ;;  %s1012_s30 = smov 0   ;;  %s1014_s10 = smov 0  }
   0x2   :  { %s1016_s11 = smov 0   ;;  %s1018_s12 = smov 0  }
   0x3 LB: > { %s1033_s13 = sadd.s32 4294967295, %s953_s12   ;;  %s790_s14 = sadd.s32 4294967294, %s953_s12   ;;  %s953_s12 = sphi %s1018_s12, %s1193_s12   ;;  %s949_s11 = sphi %s1016_s11, %s1192_s11   ;;  %s945_s10 = sphi %s1014_s10, %s1191_s10   ;;  %s941_s30 = sphi %s1012_s30, %s1190_s30  }
   0x4   : > { %s1037_s15 = sadd.s32 1, %s953_s12   ;;  %s29_s16 = sadd.s32 1, %s949_s11 }
   0x5   : > { %s26_s17 = ssub.s32 %s953_s12, %s1037_s15  ;;  %p36_p0 = scmp.ne.s32.totalorder %s949_s11, %s945_s10 }
   0x6   : > { %p27_p1 = scmp.eq.s32.totalorder %s26_s17, 0  ;;  %p37_p2 = scmp.eq.s32.totalorder %s953_s12, 0 }
   0x7   : > { %p254_p3 = scmp.eq.s32.totalorder %s1033_s13, 1  ;;  %p259_p4 = scmp.ne.s32.totalorder %s945_s10, %s941_s30 }
   0x8   : > { %s1049_s18 = scalar_select %p27_p1, %s949_s11, %s29_s16  }
   0x9   : > { %p38_p5 = por %p37_p2, %p36_p0  ;;  %p1051_p6 = por %p254_p3, %p36_p0 }
   0xa   : > { %p260_p7 = scmp.eq.s32.totalorder %s790_s14, 1  ;;  %p792_p9 = scmp.ge.s32.totalorder %s953_s12, 2 }
   0xc   : > { %p1055_p8 = por %p260_p7, %p259_p4  ;;  %288 = sbr.rel (%p792_p9) target bundleno = 26 (0x1a), region = 32 }
  0x13   : > { %291 = sbr.rel (!%p38_p5) target bundleno = 26 (0x1a), region = 36  ;;  %s293_s21 = sand.u32 (%p38_p5), 1, %s949_s11  }
  0x14   : > { %s794_s22 = sshll.u32 (%p38_p5), %s953_s12, 3  ;;  %s793_s23 = sshll.u32 (%p38_p5), %s293_s21, 4 }
  0x15   : > { %s297_s26 = scalar_lea.vmem (%p38_p5), %s1178_s0, %s794_s22  ;;  %s295_s27 = scalar_lea.vmem (%p38_p5), [#allocation2], %s793_s23 }
  0x16   : > { %v327_v0 = vld [vmem:[%s297_s26] sm:$0xff] (%p38_p5)  ;;  %v329_v1 = vld [vmem:[%s297_s26 + $0x10] sm:$0xff] (%p38_p5) }
  0x17   : > { %328 = vst [vmem:[%s295_s27] sm:$0xff] (%p38_p5), %v327_v0  ;;  %330 = vst [vmem:[%s295_s27 + $0x8] sm:$0xff] (%p38_p5), %v329_v1 }
  0x1a PF: > { %p795_p10 = scmp.ge.s32.totalorder %s953_s12, 1  ;;  %p363_p11 = scmp.lt.s32.totalorder %s953_s12, 3 }
  0x1c   : > { %p364_p12 = pnand %p795_p10, %p363_p11 }
  0x1d   : > { %v883_v2 = vld [vmem:[%s1179_s1] sm:$0xff] (!%p364_p12)   ;;  %v955_v3 = vmov (!%p364_p12), 0.0   ;;  %v884_v4 = vld [vmem:[%s1179_s1 + $0x8] sm:$0xff] (!%p364_p12)   ;;  %vm956_vm0 = vmmov (!%p364_p12), 0   ;;  %s370_s17 = sand.u32 (!%p364_p12), 1, %s945_s10   ;;  %vm457_vm1 = vcmask (!%p364_p12), 261120  }
  0x1e   : > { %367 = sbr.rel (%p364_p12) target bundleno = 1094 (0x446), region = 90  ;;  %820 = vmatprep.subr.bf16.mxu0 (!%p364_p12), %v955_v3  ;;  %828 = vmatprep.subr.bf16.mxu1 (!%p364_p12), %v955_v3  ;;  %s1078_s21 = sshll.u32 (!%p364_p12), %s370_s17, 4  ;;  %v805_v8 = vld [vmem:[%s1180_s2] ss:$0 sm:$0xff] (!%p364_p12)  ;;  %v957_v23 = vmov (!%p364_p12), 0   ;;  %v886_v38 = vld [vmem:[%s1183_s5 + $0x8] sm:$0xff] (!%p364_p12)  }
  0x1f   : > { %821 = vmatpush3.bf16.msra.mxu0 (!%p364_p12), %v883_v2  ;;  %824 = vmatprep.mubr.msk.bf16.mxu0 (!%p364_p12), %vm956_vm0, %v955_v3  ;;  %s372_s22 = scalar_lea.vmem (!%p364_p12), [#allocation2], %s1078_s21  ;;  %p421_p13 = scmp.lt.s32.totalorder (!%p364_p12), %s1033_s13, 1  ;;  %v885_v36 = vld [vmem:[%s1183_s5] sm:$0xff] (!%p364_p12)  }
  0x20   : > { %822 = vmatprep.subr.bf16.mxu0 (!%p364_p12), %v955_v3  ;;  %832 = vmatprep.mubr.msk.bf16.mxu1 (!%p364_p12), %vm956_vm0, %v955_v3  ;;  %v438_v5 = vld [vmem:[%s372_s22] sm:$0xff] (!%p364_p12)  ;;  %v439_v6 = vld [vmem:[%s372_s22 + $0x8] sm:$0xff] (!%p364_p12)  ;;  %s420_s27 = scalar_lea.vmem (!%p364_p12), [#allocation3], %s1078_s21 }
  0x21   : > { %v440_v7 = vpack.c.bf16 (!%p364_p12), %v439_v6, %v438_v5  ;;  %881 = vset.pattern.permute.xlu1 (!%p364_p12), %v957_v23  ;;  %882 = vset.pattern.permute.xlu0 (!%p364_p12), %v957_v23  ;;  %v809_v48 = vld [vmem:[%s1184_s6] ss:$0 sm:$0xff] (!%p364_p12)  ;;  %s674_s28 = sshll.u32 (!%p364_p12), %s420_s27, 4  ;;  %s1125_s28 = int_to_ptr.vmem [resolvable:$true] %s674_s28 }
  0x22   : > { %829 = vmatpush3.bf16.msra.mxu1 (!%p364_p12), %v885_v36  ;;  %s891_s21 = scalar_lea.vmem (!%p364_p12), %s1125_s28, 256 }
  0x23   : > { %823 = vmatpush3.bf16.msra.mxu0 (!%p364_p12), %v884_v4  ;;  %830 = vmatprep.subr.bf16.mxu1 (!%p364_p12), %v955_v3  ;;  %p892_p0 = scmp.ne.s32.totalorder (!%p364_p12), %s1125_s28, %s891_s21 }
  0x25   : > { %s422_s25 = scalar_select %p421_p13, %s1033_s13, 1 }
  0x26   : > { %825 = vmatmul.mubr.msk.bf16.vlgmr.msra.gmra.mrb[0].mxu0 %vm457_vm1, %v440_v7  ;;  %831 = vmatpush3.bf16.msra.mxu1 %v886_v38  ;;  %p893_p1 = pnand %p892_p0, %p1051_p6 }
  0x27   : > { %s1091_s26 = sshll.u32 %s422_s25, 3 }
  0x28   : > { %s424_s29 = scalar_lea.vmem %s1181_s3, %s1091_s26  ;;  %s428_s22 = scalar_lea.vmem %s1182_s4, %s1091_s26 }
  0x29   : > { %v527_v31 = vld [vmem:[%s424_s29] sm:$0xff]  ;;  %s436_s25 = scalar_lea.vmem %s1186_s8, %s1091_s26  ;;  %s811_s29 = sshll.u32 %s1033_s13, 7 }
  0x2a   : > { %v531_v34 = vld [vmem:[%s428_s22] sm:$0xff]  ;;  %s432_s22 = scalar_lea.vmem %s1185_s7, %s1091_s26  ;;  %s1130_s16 = scalar_lea.hbm %s1187_s9, %s811_s29 }
  0x2b   : > { %v636_v6 = vld [vmem:[%s432_s22] sm:$0xff]  ;;  %s1136_s13 = scalar_lea.sflag [#allocation4], %s370_s17  ;;  %p894_p2 = pneg %p893_p1 }
  0x2c   : > { %s958_s22 = smov [#allocation3]  }
  0x2d   : > { %s895_s23 = sshll.u32 %s958_s22, 4  ;;  %s896_s23 = int_to_ptr.vmem [resolvable:$false] %s895_s23 }
  0x2e   : > { %s897_s24 = scalar_lea.vmem %s896_s23, 512  ;;  %p898_p3 = scmp.lt.s32.totalorder %s1125_s28, %s896_s23 }
  0x2f   : > { %p899_p4 = scmp.lt.s32.totalorder %s897_s24, %s891_s21 }
  0x31   : > { %p900_p5 = por %p899_p4, %p898_p3 }
  0x33   : > { %p901_p7 = pnand %p900_p5, %p894_p2 }
  0xf9   : > { %v495_v9 = vpop.f32.mrb[0].mxu0 }
  0xfa   : > { %v509_v10 = vadd.f32 %v805_v8, %v495_v9  ;;  %v826_v11 = vpop.f32.mrb[1].mxu0  ;;  %v640_v9 = vld [vmem:[%s436_s25] sm:$0xff] }
  0xfb   : > { %v498_v12 = vpop.f32.mrb[2].mxu0 }
  0xfc   : > { %v510_v13 = vadd.f32 %v805_v8, %v498_v12  ;;  %v827_v14 = vpop.f32.mrb[3].mxu0  ;;  %v511_v15 = vsel %vm457_vm1, %v509_v10, 0.0  ;;  %v516_v17 = vmul.f32 %v509_v10, %v509_v10 }
  0xfe   : > { %v512_v16 = vsel %vm457_vm1, %v510_v13, 0.0  ;;  %v517_v18 = vmul.f32 %v510_v13, %v510_v13  ;;  %v518_v21 = vsel %vm457_vm1, %v516_v17, 0.0 }
  0xff   : > { %v513_v19 = vadd.f32 %v512_v16, %v511_v15 }
 0x100   : > { %v519_v20 = vsel %vm457_vm1, %v517_v18, 0.0 }
 0x101   : > { %514 = vadd.xlane.f32.xlu0 %v513_v19  ;;  %v520_v22 = vadd.f32 %v519_v20, %v518_v21 }
 0x105   : > { %521 = vadd.xlane.f32.xlu0 %v520_v22 }
 0x18e   : > { %v515_v24 = vpop.xlane.xlu0 %514 }
 0x18f   : > { %v523_v25 = vmul.f32 0.015625, %v515_v24 }
 0x191   : > { %v525_v27 = vmul.f32 %v523_v25, %v523_v25 }
 0x192   : > { %v522_v26 = vpop.xlane.xlu0 %521 }
 0x193   : > { %v524_v28 = vmul.f32 0.015625, %v522_v26 }
 0x195   : > { %v526_v29 = vsub.f32 %v524_v28, %v525_v27 }
 0x197   : > { %v528_v30 = vadd.f32 1e-05, %v526_v29 }
 0x199   : > { %887 = vrsqrt.f32 %v528_v30 }
 0x1a3   : > { %v888_v32 = vpop.eup %887 }
 0x1a4   : > { %v530_v33 = vmul.f32 %v888_v32, %v527_v31 }
 0x1a6   : > { %536 = vperm.xlu1 %881, %v530_v33   ;;  %v532_v35 = vmul.f32 %v530_v33, %v523_v25 }
 0x1a8   : > { %v533_v37 = vsub.f32 %v531_v34, %v532_v35 }
 0x1aa   : > { %543 = vperm.xlu1 %881, %v533_v37  }
 0x225   : > { %v537_v39 = vpop.permute.xlu1 %536 }
 0x226   : > { %v539_v40 = vmul.f32 %v537_v39, %v509_v10  ;;  %v540_v41 = vmul.f32 %v537_v39, %v510_v13 }
 0x229   : > { %v544_v42 = vpop.permute.xlu1 %543 }
 0x22a   : > { %v546_v43 = vadd.f32 %v544_v42, %v539_v40  ;;  %v547_v44 = vadd.f32 %v544_v42, %v540_v41 }
 0x22c   : > { %v548_v45 = vmax.f32 %v546_v43, 0.0  ;;  %v549_v46 = vmax.f32 %v547_v44, 0.0 }
 0x22e   : > { %v550_v47 = vpack.c.bf16 %v549_v46, %v548_v45 }
 0x230   : > { %833 = vmatmul.mubr.msk.bf16.vlgmr.msra.gmra.mrb[0].mxu1 %vm457_vm1, %v550_v47 }
 0x303   : > { %v604_v49 = vpop.f32.mrb[0].mxu1 }
 0x304   : > { %v618_v50 = vadd.f32 %v809_v48, %v604_v49  ;;  %v834_v51 = vpop.f32.mrb[1].mxu1 }
 0x305   : > { %v607_v52 = vpop.f32.mrb[2].mxu1 }
 0x306   : > { %v619_v53 = vadd.f32 %v809_v48, %v607_v52  ;;  %v835_v54 = vpop.f32.mrb[3].mxu1  ;;  %v625_v55 = vmul.f32 %v618_v50, %v618_v50  ;;  %v620_v56 = vsel %vm457_vm1, %v618_v50, 0.0 }
 0x308   : > { %v621_v57 = vsel %vm457_vm1, %v619_v53, 0.0  ;;  %v626_v58 = vmul.f32 %v619_v53, %v619_v53  ;;  %v627_v60 = vsel %vm457_vm1, %v625_v55, 0.0 }
 0x309   : > { %v622_v59 = vadd.f32 %v621_v57, %v620_v56 }
 0x30a   : > { %v628_v61 = vsel %vm457_vm1, %v626_v58, 0.0 }
 0x30b   : > { %623 = vadd.xlane.f32.xlu0 %v622_v59  ;;  %v629_v62 = vadd.f32 %v628_v61, %v627_v60 }
 0x30d   : > { %630 = vadd.xlane.f32.xlu1 %v629_v62 }
 0x398   : > { %v624_v63 = vpop.xlane.xlu0 %623 }
 0x399   : > { %v632_v0 = vmul.f32 0.015625, %v624_v63 }
 0x39a   : > { %v631_v1 = vpop.xlane.xlu1 %630 }
 0x39b   : > { %v634_v2 = vmul.f32 %v632_v0, %v632_v0  ;;  %v633_v3 = vmul.f32 0.015625, %v631_v1 }
 0x39d   : > { %v635_v4 = vsub.f32 %v633_v3, %v634_v2 }
 0x39f   : > { %v637_v5 = vadd.f32 1e-05, %v635_v4 }
 0x3a1   : > { %889 = vrsqrt.f32 %v637_v5 }
 0x3ab   : > { %v890_v7 = vpop.eup %889 }
 0x3ac   : > { %v639_v8 = vmul.f32 %v890_v7, %v636_v6 }
 0x3ae   : > { %645 = vperm.xlu0 %882, %v639_v8   ;;  %v641_v10 = vmul.f32 %v639_v8, %v632_v0 }
 0x3b0   : > { %v642_v11 = vsub.f32 %v640_v9, %v641_v10 }
 0x3b2   : > { %652 = vperm.xlu1 %881, %v642_v11  }
 0x42d   : > { %v646_v12 = vpop.permute.xlu0 %645 }
 0x42e   : > { %v648_v13 = vmul.f32 %v646_v12, %v618_v50  ;;  %v649_v14 = vmul.f32 %v646_v12, %v619_v53 }
 0x431   : > { %v653_v15 = vpop.permute.xlu1 %652 }
 0x432   : > { %v655_v16 = vadd.f32 %v653_v15, %v648_v13  ;;  %v656_v17 = vadd.f32 %v653_v15, %v649_v14 }
 0x434   : > { %v657_v18 = vmax.f32 %v655_v16, 0.0  ;;  %v658_v19 = vmax.f32 %v656_v17, 0.0 }
 0x436   : > { %659 = vst.msk [vmem:[%s420_s27] sm:$0xff] %vm457_vm1, %v657_v18  ;;  %660 = vst.msk [vmem:[%s420_s27 + $0x8] sm:$0xff] %vm457_vm1, %v658_v19 }
 0x437   : > { %904 = shalt.err (!%p901_p7)
}
 0x438   : > { %s905_s17 = scalar_lea.hbm %s1130_s16, 256  ;;  %s909_s29 = scalar_lea.hbm %s1187_s9, 512 }
 0x439   : > { %p906_p10 = scmp.ne.s32.totalorder %s1130_s16, %s905_s17  ;;  %p910_p13 = scmp.lt.u32.totalorder %s1130_s16, %s1187_s9 }
 0x43a   : > { %p911_p0 = scmp.lt.u32.totalorder %s909_s29, %s905_s17  ;;  %p913_p2 = scmp.lt.u32.totalorder %s905_s17, %s1130_s16 }
 0x43b   : > { %p907_p11 = pnand %p906_p10, %p1051_p6 }
 0x43c   : > { %p912_p1 = por %p911_p0, %p910_p13 }
 0x43d   : > { %p908_p12 = pneg %p907_p11 }
 0x43e   : > { %p914_p3 = por %p913_p2, %p912_p1 }
 0x440   : > { %p915_p4 = pnand %p914_p3, %p908_p12 }
 0x442   : > { %918 = shalt.err (!%p915_p4)
}
 0x443   : > { %s959_s21 = smov 128   ;;  %s960_s22 = smov 256  }
 0x444   : > { %s961_s23 = smov 8  }
 0x445   : > { %836 = dma.vmem_to_hbm [thread:$0]  (%p1051_p6), %s1125_s28, 256, %s1130_s16, %s1136_s13, %s959_s21, %s960_s22, %s961_s23  }
 0x446 PF: > { %s689_s24 = sand.u32 1, %s941_s30   ;;  %p839_p5 = pnand %p792_p9, %p1055_p8 }
 0x447   : > { %s690_s17 = scalar_lea.sflag [#allocation4], %s689_s24 }
 0x448   : > { %936 = dma.done.wait (!%p839_p5), %s690_s17, 256  }
 0x449   : > { %938 = vsyncadd (!%p839_p5), %s690_s17, 4294967040  ;;  %p19_p7 = scmp.ge.s32.totalorder %s1037_s15, 4   ;;  %s1190_s30 = smov %s945_s10 }
 0x44a   : > { %s1191_s10 = smov %s949_s11  ;;  %s1192_s11 = smov %s1049_s18 }
 0x44b   : > { %s1193_s12 = smov %s1037_s15  ;;  %21 = sbr.rel (!%p19_p7) target bundleno = 3 (0x3), region = 146 }
 0x452   :  { %695 = vsyncpa [#allocation4], 1 }
 0x453   :  { %697 = vsyncpa [#allocation4 + $0x1], 1 }

// kernel: tpu_custom_call.1
= control target key start
LH: loop header
LB: loop body
LE: loop exit
PB: predicated region body
PF: predicated region fallthrough
CT: control target
= control target key end

     0   :  { %14 = vsyncpa [#allocation4], 0  ;;  %s1178_s0 = inlined_call_operand.vmem [shape: f32[2,16,32], index: 0, kind: input, shape index: {}]   ;;  %s1179_s1 = inlined_call_operand.vmem [shape: bf16[32,32], index: 1, kind: input, shape index: {}]   ;;  %s1180_s2 = inlined_call_operand.vmem [shape: f32[1,32], index: 2, kind: input, shape index: {}]   ;;  %s1181_s3 = inlined_call_operand.vmem [shape: f32[16,1], index: 3, kind: input, shape index: {}]   ;;  %s1182_s4 = inlined_call_operand.vmem [shape: f32[16,1], index: 4, kind: input, shape index: {}]   ;;  %s1183_s5 = inlined_call_operand.vmem [shape: bf16[32,32], index: 5, kind: input, shape index: {}]   ;;  %s1184_s6 = inlined_call_operand.vmem [shape: f32[1,32], index: 6, kind: input, shape index: {}]   ;;  %s1185_s7 = inlined_call_operand.vmem [shape: f32[16,1], index: 7, kind: input, shape index: {}]   ;;  %s1186_s8 = inlined_call_operand.vmem [shape: f32[16,1], index: 8, kind: input, shape index: {}]   ;;  %s1187_s9 = inlined_call_operand.hbm [shape: f32[2,16,32], index: 9, kind: output, shape index: {}]  }
   0x1   :  { %16 = vsyncpa [#allocation4 + $0x1], 0  ;;  %s1012_s30 = smov 0   ;;  %s1014_s10 = smov 0  }
   0x2   :  { %s1016_s11 = smov 0   ;;  %s1018_s12 = smov 0  }
   0x3 LB: > { %s1033_s13 = sadd.s32 4294967295, %s953_s12   ;;  %s790_s14 = sadd.s32 4294967294, %s953_s12   ;;  %s953_s12 = sphi %s1018_s12, %s1193_s12   ;;  %s949_s11 = sphi %s1016_s11, %s1192_s11   ;;  %s945_s10 = sphi %s1014_s10, %s1191_s10   ;;  %s941_s30 = sphi %s1012_s30, %s1190_s30  }
   0x4   : > { %s1037_s15 = sadd.s32 1, %s953_s12   ;;  %s29_s16 = sadd.s32 1, %s949_s11 }
   0x5   : > { %s26_s17 = ssub.s32 %s953_s12, %s1037_s15  ;;  %p36_p0 = scmp.ne.s32.totalorder %s949_s11, %s945_s10 }
   0x6   : > { %p27_p1 = scmp.eq.s32.totalorder %s26_s17, 0  ;;  %p37_p2 = scmp.eq.s32.totalorder %s953_s12, 0 }
   0x7   : > { %p254_p3 = scmp.eq.s32.totalorder %s1033_s13, 1  ;;  %p259_p4 = scmp.ne.s32.totalorder %s945_s10, %s941_s30 }
   0x8   : > { %s1049_s18 = scalar_select %p27_p1, %s949_s11, %s29_s16  }
   0x9   : > { %p38_p5 = por %p37_p2, %p36_p0  ;;  %p1051_p6 = por %p254_p3, %p36_p0 }
   0xa   : > { %p260_p7 = scmp.eq.s32.totalorder %s790_s14, 1  ;;  %p792_p9 = scmp.ge.s32.totalorder %s953_s12, 2 }
   0xc   : > { %p1055_p8 = por %p260_p7, %p259_p4  ;;  %288 = sbr.rel (%p792_p9) target bundleno = 26 (0x1a), region = 32 }
  0x13   : > { %291 = sbr.rel (!%p38_p5) target bundleno = 26 (0x1a), region = 36  ;;  %s293_s21 = sand.u32 (%p38_p5), 1, %s949_s11  }
  0x14   : > { %s794_s22 = sshll.u32 (%p38_p5), %s953_s12, 3  ;;  %s793_s23 = sshll.u32 (%p38_p5), %s293_s21, 4 }
  0x15   : > { %s297_s26 = scalar_lea.vmem (%p38_p5), %s1178_s0, %s794_s22  ;;  %s295_s27 = scalar_lea.vmem (%p38_p5), [#allocation2], %s793_s23 }
  0x16   : > { %v327_v0 = vld [vmem:[%s297_s26] sm:$0xff] (%p38_p5)  ;;  %v329_v1 = vld [vmem:[%s297_s26 + $0x10] sm:$0xff] (%p38_p5) }
  0x17   : > { %328 = vst [vmem:[%s295_s27] sm:$0xff] (%p38_p5), %v327_v0  ;;  %330 = vst [vmem:[%s295_s27 + $0x8] sm:$0xff] (%p38_p5), %v329_v1 }
  0x1a PF: > { %p795_p10 = scmp.ge.s32.totalorder %s953_s12, 1  ;;  %p363_p11 = scmp.lt.s32.totalorder %s953_s12, 3 }
  0x1c   : > { %p364_p12 = pnand %p795_p10, %p363_p11 }
  0x1d   : > { %v883_v2 = vld [vmem:[%s1179_s1] sm:$0xff] (!%p364_p12)   ;;  %v955_v3 = vmov (!%p364_p12), 0.0   ;;  %v884_v4 = vld [vmem:[%s1179_s1 + $0x8] sm:$0xff] (!%p364_p12)   ;;  %vm956_vm0 = vmmov (!%p364_p12), 0   ;;  %s370_s17 = sand.u32 (!%p364_p12), 1, %s945_s10   ;;  %vm457_vm1 = vcmask (!%p364_p12), 261120  }
  0x1e   : > { %367 = sbr.rel (%p364_p12) target bundleno = 1094 (0x446), region = 90  ;;  %820 = vmatprep.subr.bf16.mxu0 (!%p364_p12), %v955_v3  ;;  %828 = vmatprep.subr.bf16.mxu1 (!%p364_p12), %v955_v3  ;;  %s1078_s21 = sshll.u32 (!%p364_p12), %s370_s17, 4  ;;  %v805_v8 = vld [vmem:[%s1180_s2] ss:$0 sm:$0xff] (!%p364_p12)  ;;  %v957_v23 = vmov (!%p364_p12), 0   ;;  %v886_v38 = vld [vmem:[%s1183_s5 + $0x8] sm:$0xff] (!%p364_p12)  }
  0x1f   : > { %821 = vmatpush3.bf16.msra.mxu0 (!%p364_p12), %v883_v2  ;;  %824 = vmatprep.mubr.msk.bf16.mxu0 (!%p364_p12), %vm956_vm0, %v955_v3  ;;  %s372_s22 = scalar_lea.vmem (!%p364_p12), [#allocation2], %s1078_s21  ;;  %p421_p13 = scmp.lt.s32.totalorder (!%p364_p12), %s1033_s13, 1  ;;  %v885_v36 = vld [vmem:[%s1183_s5] sm:$0xff] (!%p364_p12)  }
  0x20   : > { %822 = vmatprep.subr.bf16.mxu0 (!%p364_p12), %v955_v3  ;;  %832 = vmatprep.mubr.msk.bf16.mxu1 (!%p364_p12), %vm956_vm0, %v955_v3  ;;  %v438_v5 = vld [vmem:[%s372_s22] sm:$0xff] (!%p364_p12)  ;;  %v439_v6 = vld [vmem:[%s372_s22 + $0x8] sm:$0xff] (!%p364_p12)  ;;  %s420_s27 = scalar_lea.vmem (!%p364_p12), [#allocation3], %s1078_s21 }
  0x21   : > { %v440_v7 = vpack.c.bf16 (!%p364_p12), %v439_v6, %v438_v5  ;;  %881 = vset.pattern.permute.xlu1 (!%p364_p12), %v957_v23  ;;  %882 = vset.pattern.permute.xlu0 (!%p364_p12), %v957_v23  ;;  %v809_v48 = vld [vmem:[%s1184_s6] ss:$0 sm:$0xff] (!%p364_p12)  ;;  %s674_s28 = sshll.u32 (!%p364_p12), %s420_s27, 4  ;;  %s1125_s28 = int_to_ptr.vmem [resolvable:$true] %s674_s28 }
  0x22   : > { %829 = vmatpush3.bf16.msra.mxu1 (!%p364_p12), %v885_v36  ;;  %s891_s21 = scalar_lea.vmem (!%p364_p12), %s1125_s28, 256 }
  0x23   : > { %823 = vmatpush3.bf16.msra.mxu0 (!%p364_p12), %v884_v4  ;;  %830 = vmatprep.subr.bf16.mxu1 (!%p364_p12), %v955_v3  ;;  %p892_p0 = scmp.ne.s32.totalorder (!%p364_p12), %s1125_s28, %s891_s21 }
  0x25   : > { %s422_s25 = scalar_select %p421_p13, %s1033_s13, 1 }
  0x26   : > { %825 = vmatmul.mubr.msk.bf16.vlgmr.msra.gmra.mrb[0].mxu0 %vm457_vm1, %v440_v7  ;;  %831 = vmatpush3.bf16.msra.mxu1 %v886_v38  ;;  %p893_p1 = pnand %p892_p0, %p1051_p6 }
  0x27   : > { %s1091_s26 = sshll.u32 %s422_s25, 3 }
  0x28   : > { %s424_s29 = scalar_lea.vmem %s1181_s3, %s1091_s26  ;;  %s428_s22 = scalar_lea.vmem %s1182_s4, %s1091_s26 }
  0x29   : > { %v527_v31 = vld [vmem:[%s424_s29] sm:$0xff]  ;;  %s436_s25 = scalar_lea.vmem %s1186_s8, %s1091_s26  ;;  %s811_s29 = sshll.u32 %s1033_s13, 7 }
  0x2a   : > { %v531_v34 = vld [vmem:[%s428_s22] sm:$0xff]  ;;  %s432_s22 = scalar_lea.vmem %s1185_s7, %s1091_s26  ;;  %s1130_s16 = scalar_lea.hbm %s1187_s9, %s811_s29 }
  0x2b   : > { %v636_v6 = vld [vmem:[%s432_s22] sm:$0xff]  ;;  %s1136_s13 = scalar_lea.sflag [#allocation4], %s370_s17  ;;  %p894_p2 = pneg %p893_p1 }
  0x2c   : > { %s958_s22 = smov [#allocation3]  }
  0x2d   : > { %s895_s23 = sshll.u32 %s958_s22, 4  ;;  %s896_s23 = int_to_ptr.vmem [resolvable:$false] %s895_s23 }
  0x2e   : > { %s897_s24 = scalar_lea.vmem %s896_s23, 512  ;;  %p898_p3 = scmp.lt.s32.totalorder %s1125_s28, %s896_s23 }
  0x2f   : > { %p899_p4 = scmp.lt.s32.totalorder %s897_s24, %s891_s21 }
  0x31   : > { %p900_p5 = por %p899_p4, %p898_p3 }
  0x33   : > { %p901_p7 = pnand %p900_p5, %p894_p2 }
  0xf9   : > { %v495_v9 = vpop.f32.mrb[0].mxu0 }
  0xfa   : > { %v509_v10 = vadd.f32 %v805_v8, %v495_v9  ;;  %v826_v11 = vpop.f32.mrb[1].mxu0  ;;  %v640_v9 = vld [vmem:[%s436_s25] sm:$0xff] }
  0xfb   : > { %v498_v12 = vpop.f32.mrb[2].mxu0 }
  0xfc   : > { %v510_v13 = vadd.f32 %v805_v8, %v498_v12  ;;  %v827_v14 = vpop.f32.mrb[3].mxu0  ;;  %v511_v15 = vsel %vm457_vm1, %v509_v10, 0.0  ;;  %v516_v17 = vmul.f32 %v509_v10, %v509_v10 }
  0xfe   : > { %v512_v16 = vsel %vm457_vm1, %v510_v13, 0.0  ;;  %v517_v18 = vmul.f32 %v510_v13, %v510_v13  ;;  %v518_v21 = vsel %vm457_vm1, %v516_v17, 0.0 }
  0xff   : > { %v513_v19 = vadd.f32 %v512_v16, %v511_v15 }
 0x100   : > { %v519_v20 = vsel %vm457_vm1, %v517_v18, 0.0 }
 0x101   : > { %514 = vadd.xlane.f32.xlu0 %v513_v19  ;;  %v520_v22 = vadd.f32 %v519_v20, %v518_v21 }
 0x105   : > { %521 = vadd.xlane.f32.xlu0 %v520_v22 }
 0x18e   : > { %v515_v24 = vpop.xlane.xlu0 %514 }
 0x18f   : > { %v523_v25 = vmul.f32 0.015625, %v515_v24 }
 0x191   : > { %v525_v27 = vmul.f32 %v523_v25, %v523_v25 }
 0x192   : > { %v522_v26 = vpop.xlane.xlu0 %521 }
 0x193   : > { %v524_v28 = vmul.f32 0.015625, %v522_v26 }
 0x195   : > { %v526_v29 = vsub.f32 %v524_v28, %v525_v27 }
 0x197   : > { %v528_v30 = vadd.f32 1e-05, %v526_v29 }
 0x199   : > { %887 = vrsqrt.f32 %v528_v30 }
 0x1a3   : > { %v888_v32 = vpop.eup %887 }
 0x1a4   : > { %v530_v33 = vmul.f32 %v888_v32, %v527_v31 }
 0x1a6   : > { %536 = vperm.xlu1 %881, %v530_v33   ;;  %v532_v35 = vmul.f32 %v530_v33, %v523_v25 }
 0x1a8   : > { %v533_v37 = vsub.f32 %v531_v34, %v532_v35 }
 0x1aa   : > { %543 = vperm.xlu1 %881, %v533_v37  }
 0x225   : > { %v537_v39 = vpop.permute.xlu1 %536 }
 0x226   : > { %v539_v40 = vmul.f32 %v537_v39, %v509_v10  ;;  %v540_v41 = vmul.f32 %v537_v39, %v510_v13 }
 0x229   : > { %v544_v42 = vpop.permute.xlu1 %543 }
 0x22a   : > { %v546_v43 = vadd.f32 %v544_v42, %v539_v40  ;;  %v547_v44 = vadd.f32 %v544_v42, %v540_v41 }
 0x22c   : > { %v548_v45 = vmax.f32 %v546_v43, 0.0  ;;  %v549_v46 = vmax.f32 %v547_v44, 0.0 }
 0x22e   : > { %v550_v47 = vpack.c.bf16 %v549_v46, %v548_v45 }
 0x230   : > { %833 = vmatmul.mubr.msk.bf16.vlgmr.msra.gmra.mrb[0].mxu1 %vm457_vm1, %v550_v47 }
 0x303   : > { %v604_v49 = vpop.f32.mrb[0].mxu1 }
 0x304   : > { %v618_v50 = vadd.f32 %v809_v48, %v604_v49  ;;  %v834_v51 = vpop.f32.mrb[1].mxu1 }
 0x305   : > { %v607_v52 = vpop.f32.mrb[2].mxu1 }
 0x306   : > { %v619_v53 = vadd.f32 %v809_v48, %v607_v52  ;;  %v835_v54 = vpop.f32.mrb[3].mxu1  ;;  %v625_v55 = vmul.f32 %v618_v50, %v618_v50  ;;  %v620_v56 = vsel %vm457_vm1, %v618_v50, 0.0 }
 0x308   : > { %v621_v57 = vsel %vm457_vm1, %v619_v53, 0.0  ;;  %v626_v58 = vmul.f32 %v619_v53, %v619_v53  ;;  %v627_v60 = vsel %vm457_vm1, %v625_v55, 0.0 }
 0x309   : > { %v622_v59 = vadd.f32 %v621_v57, %v620_v56 }
 0x30a   : > { %v628_v61 = vsel %vm457_vm1, %v626_v58, 0.0 }
 0x30b   : > { %623 = vadd.xlane.f32.xlu0 %v622_v59  ;;  %v629_v62 = vadd.f32 %v628_v61, %v627_v60 }
 0x30d   : > { %630 = vadd.xlane.f32.xlu1 %v629_v62 }
 0x398   : > { %v624_v63 = vpop.xlane.xlu0 %623 }
 0x399   : > { %v632_v0 = vmul.f32 0.015625, %v624_v63 }
 0x39a   : > { %v631_v1 = vpop.xlane.xlu1 %630 }
 0x39b   : > { %v634_v2 = vmul.f32 %v632_v0, %v632_v0  ;;  %v633_v3 = vmul.f32 0.015625, %v631_v1 }
 0x39d   : > { %v635_v4 = vsub.f32 %v633_v3, %v634_v2 }
 0x39f   : > { %v637_v5 = vadd.f32 1e-05, %v635_v4 }
 0x3a1   : > { %889 = vrsqrt.f32 %v637_v5 }
 0x3ab   : > { %v890_v7 = vpop.eup %889 }
 0x3ac   : > { %v639_v8 = vmul.f32 %v890_v7, %v636_v6 }
 0x3ae   : > { %645 = vperm.xlu0 %882, %v639_v8   ;;  %v641_v10 = vmul.f32 %v639_v8, %v632_v0 }
 0x3b0   : > { %v642_v11 = vsub.f32 %v640_v9, %v641_v10 }
 0x3b2   : > { %652 = vperm.xlu1 %881, %v642_v11  }
 0x42d   : > { %v646_v12 = vpop.permute.xlu0 %645 }
 0x42e   : > { %v648_v13 = vmul.f32 %v646_v12, %v618_v50  ;;  %v649_v14 = vmul.f32 %v646_v12, %v619_v53 }
 0x431   : > { %v653_v15 = vpop.permute.xlu1 %652 }
 0x432   : > { %v655_v16 = vadd.f32 %v653_v15, %v648_v13  ;;  %v656_v17 = vadd.f32 %v653_v15, %v649_v14 }
 0x434   : > { %v657_v18 = vmax.f32 %v655_v16, 0.0  ;;  %v658_v19 = vmax.f32 %v656_v17, 0.0 }
 0x436   : > { %659 = vst.msk [vmem:[%s420_s27] sm:$0xff] %vm457_vm1, %v657_v18  ;;  %660 = vst.msk [vmem:[%s420_s27 + $0x8] sm:$0xff] %vm457_vm1, %v658_v19 }
 0x437   : > { %904 = shalt.err (!%p901_p7)
}
 0x438   : > { %s905_s17 = scalar_lea.hbm %s1130_s16, 256  ;;  %s909_s29 = scalar_lea.hbm %s1187_s9, 512 }
 0x439   : > { %p906_p10 = scmp.ne.s32.totalorder %s1130_s16, %s905_s17  ;;  %p910_p13 = scmp.lt.u32.totalorder %s1130_s16, %s1187_s9 }
 0x43a   : > { %p911_p0 = scmp.lt.u32.totalorder %s909_s29, %s905_s17  ;;  %p913_p2 = scmp.lt.u32.totalorder %s905_s17, %s1130_s16 }
 0x43b   : > { %p907_p11 = pnand %p906_p10, %p1051_p6 }
 0x43c   : > { %p912_p1 = por %p911_p0, %p910_p13 }
 0x43d   : > { %p908_p12 = pneg %p907_p11 }
 0x43e   : > { %p914_p3 = por %p913_p2, %p912_p1 }
 0x440   : > { %p915_p4 = pnand %p914_p3, %p908_p12 }
 0x442   : > { %918 = shalt.err (!%p915_p4)
}
 0x443   : > { %s959_s21 = smov 128   ;;  %s960_s22 = smov 256  }
 0x444   : > { %s961_s23 = smov 8  }
 0x445   : > { %836 = dma.vmem_to_hbm [thread:$0]  (%p1051_p6), %s1125_s28, 256, %s1130_s16, %s1136_s13, %s959_s21, %s960_s22, %s961_s23  }
 0x446 PF: > { %s689_s24 = sand.u32 1, %s941_s30   ;;  %p839_p5 = pnand %p792_p9, %p1055_p8 }
 0x447   : > { %s690_s17 = scalar_lea.sflag [#allocation4], %s689_s24 }
 0x448   : > { %936 = dma.done.wait (!%p839_p5), %s690_s17, 256  }
 0x449   : > { %938 = vsyncadd (!%p839_p5), %s690_s17, 4294967040  ;;  %p19_p7 = scmp.ge.s32.totalorder %s1037_s15, 4   ;;  %s1190_s30 = smov %s945_s10 }
 0x44a   : > { %s1191_s10 = smov %s949_s11  ;;  %s1192_s11 = smov %s1049_s18 }
 0x44b   : > { %s1193_s12 = smov %s1037_s15  ;;  %21 = sbr.rel (!%p19_p7) target bundleno = 3 (0x3), region = 146 }
 0x452   :  { %695 = vsyncpa [#allocation4], 1 }
 0x453   :  { %697 = vsyncpa [#allocation4 + $0x1], 1 }

</bundles_post_ra>
